<compile_context>
chip_gen: v6e
topology: v6e:2x2x1
jax: 0.10.0
libtpu: 0.0.40
codegen_flags: <defaults>
</compile_context>

<pallas_src>
import jax
import jax.numpy as jnp
from jax import lax
from jax.experimental import pallas as pl
from jax.experimental.pallas import tpu as pltpu


# ----------------------------------------------------------------------------
# Kernel
# ----------------------------------------------------------------------------
def bottleneck_kernel(x_ref, w1_ref, b1_ref, w2_ref, b2_ref, w3_ref, b3_ref,
                      sdn_ref, sup_ref, o_ref):
    f32, bf16 = jnp.float32, jnp.bfloat16

    x = x_ref[...]                                        # (N*H, W*Cin) f32, lane-dense

    # ---- conv1 (1x1, BN scale pre-folded) + bias + ReLU ---------------------
    t1 = jnp.dot(x.astype(bf16), w1_ref[...], preferred_element_type=f32)
    t1 = jnp.maximum(t1 + b1_ref[...], 0.0)               # (N*H, W*P) f32
    t1b = t1.astype(bf16)

    # ---- conv2 (3x3, stride=1, pad=1) + bias + ReLU -------------------------
    # Vertical taps: exact 0/1 shift matrices (block-diagonal per image, zero
    # rows at h borders -> implicit zero padding, no cross-image leakage).
    t1_dn = jnp.dot(sdn_ref[...], t1b, preferred_element_type=f32)   # src row h-1
    t1_up = jnp.dot(sup_ref[...], t1b, preferred_element_type=f32)   # src row h+1
    # Horizontal + channel taps are folded into banded weight blocks (one per
    # dy), stacked so the whole 3x3 conv is one matmul with K = 3*W*P.
    col = jnp.concatenate([t1_dn, t1, t1_up], axis=1).astype(bf16)   # (N*H, 3*W*P)
    t2 = jnp.dot(col, w2_ref[...], preferred_element_type=f32)
    t2 = jnp.maximum(t2 + b2_ref[...], 0.0)               # (N*H, W*P) f32

    # ---- conv3 (1x1) + bias + residual add (no_relu=True) -------------------
    t3 = jnp.dot(t2.astype(bf16), w3_ref[...], preferred_element_type=f32)
    o_ref[...] = (t3 + b3_ref[...] + x).astype(o_ref.dtype)


# ----------------------------------------------------------------------------
# Wrapper
# ----------------------------------------------------------------------------
def bottleneck_pallas(x_nhwc, packed):
    (w1big, b1big, w2big, b2big, w3big, b3big, sdn, sup) = packed
    N, H, W, Cin = x_nhwc.shape
    WCout = b3big.shape[1]
    Cout = WCout // W
    NH = N * H

    # Contiguous (metadata-only) reshape to a lane-dense 2-D slab.
    x2d = x_nhwc.reshape(NH, W * Cin)

    def full_spec(arr):
        nd = arr.ndim
        return pl.BlockSpec(arr.shape, lambda i, _nd=nd: (0,) * _nd)

    out2d = pl.pallas_call(
        bottleneck_kernel,
        out_shape=jax.ShapeDtypeStruct((NH, WCout), jnp.float32),
        grid=(1,),
        in_specs=[full_spec(a) for a in
                  (x2d, w1big, b1big, w2big, b2big, w3big, b3big, sdn, sup)],
        out_specs=pl.BlockSpec((NH, WCout), lambda i: (0, 0)),
        compiler_params=pltpu.CompilerParams(
            dimension_semantics=("arbitrary",)),
    )(x2d, w1big, b1big, w2big, b2big, w3big, b3big, sdn, sup)

    return out2d.reshape(N, H, W, Cout)


# ----------------------------------------------------------------------------
# Parameter preparation (plain JAX, runs once outside the kernel)
# ----------------------------------------------------------------------------
def fold_bn(raw):
    """Fold eval-mode BN scale into conv weights (exact: ReLU follows scale+bias)."""
    (w1, s1, b1, w2, s2, b2, w3, s3, b3) = raw
    return (w1 * s1[None, :], b1,
            w2 * s2[None, None, None, :], b2,
            w3 * s3[None, :], b3)


def pack_for_kernel(folded, N, H, W):
    """Expand folded weights into lane-dense block/banded matrices + shift mats."""
    (w1f, b1, w2f, b2, w3f, b3) = folded
    Cin, P = w1f.shape
    Cout = w3f.shape[1]
    f32, bf16 = jnp.float32, jnp.bfloat16

    eye_w = jnp.eye(W, dtype=f32)
    # 1x1 convs as block-diagonal matmuls over the (w, c) lane packing.
    w1big = jnp.kron(eye_w, w1f)                          # (W*Cin, W*P)
    w3big = jnp.kron(eye_w, w3f)                          # (W*P,  W*Cout)

    # Banded blocks for the 3x3's horizontal (dx) + channel taps, one per dy,
    # stacked vertically so conv2 is a single K = 3*W*P matmul.
    bands = [sum(jnp.kron(jnp.eye(W, W, k=1 - dx, dtype=f32), w2f[dy, dx])
                 for dx in range(3)) for dy in range(3)]
    w2big = jnp.concatenate(bands, axis=0)                # (3*W*P, W*P)

    # Vertical shift matrices over rows r = n*H + h (block-diagonal per image;
    # missing rows at the h borders give exact zero padding).
    sdn = jnp.kron(jnp.eye(N, dtype=f32), jnp.eye(H, H, k=-1, dtype=f32))
    sup = jnp.kron(jnp.eye(N, dtype=f32), jnp.eye(H, H, k=1, dtype=f32))

    # Biases broadcast to the (w, c) lane packing.
    b1big = jnp.tile(b1, W).reshape(1, W * P).astype(f32)
    b2big = jnp.tile(b2, W).reshape(1, W * P).astype(f32)
    b3big = jnp.tile(b3, W).reshape(1, W * Cout).astype(f32)

    return (w1big.astype(bf16), b1big, w2big.astype(bf16), b2big,
            w3big.astype(bf16), b3big, sdn.astype(bf16), sup.astype(bf16))


def make_params(key, inplanes, planes, expansion=2):
    """Deterministic synthetic parameters; BN (eval mode) kept as scale/bias."""
    ks = jax.random.split(key, 12)
    eps = 1e-5

    def bn_fold(kg, kb, km, kv, c):
        gamma = 1.0 + 0.1 * jax.random.normal(kg, (c,), jnp.float32)
        beta = 0.1 * jax.random.normal(kb, (c,), jnp.float32)
        mean = 0.1 * jax.random.normal(km, (c,), jnp.float32)
        var = 1.0 + 0.1 * jax.random.uniform(kv, (c,), jnp.float32)
        scale = gamma / jnp.sqrt(var + eps)
        bias = beta - mean * scale
        return scale, bias

    cout = planes * expansion
    w1 = 0.3 * jax.random.normal(ks[0], (inplanes, planes), jnp.float32)      # 1x1 (Cin,P)
    w2 = 0.1 * jax.random.normal(ks[1], (3, 3, planes, planes), jnp.float32)  # 3x3 HWIO
    w3 = 0.3 * jax.random.normal(ks[2], (planes, cout), jnp.float32)          # 1x1 (P,2P)
    s1, b1 = bn_fold(ks[3], ks[4], ks[5], ks[6], planes)
    s2, b2 = bn_fold(ks[7], ks[8], ks[9], ks[10], planes)
    s3, b3 = bn_fold(ks[11], ks[3], ks[7], ks[0], cout)
    return (w1, s1, b1, w2, s2, b2, w3, s3, b3)


# ----------------------------------------------------------------------------
# References
# ----------------------------------------------------------------------------
def bottleneck_reference_f32(x, raw):
    """Pure-f32 lax.conv reference (module semantics, eval-mode BN)."""
    (w1, s1, b1, w2, s2, b2, w3, s3, b3) = raw
    dn = ("NHWC", "HWIO", "NHWC")
    y = lax.conv_general_dilated(x, w1[None, None], (1, 1), "VALID",
                                 dimension_numbers=dn)
    y = jnp.maximum(y * s1 + b1, 0.0)
    y = lax.conv_general_dilated(y, w2, (1, 1), ((1, 1), (1, 1)),
                                 dimension_numbers=dn)
    y = jnp.maximum(y * s2 + b2, 0.0)
    y = lax.conv_general_dilated(y, w3[None, None], (1, 1), "VALID",
                                 dimension_numbers=dn)
    y = y * s3 + b3
    return y + x


def bottleneck_reference_bf16(x, folded):
    """Precision-matched reference: bf16 conv operands, f32 accumulate/elementwise."""
    (w1f, b1, w2f, b2, w3f, b3) = folded
    bf16, f32 = jnp.bfloat16, jnp.float32
    dn = ("NHWC", "HWIO", "NHWC")

    def conv(a, w, pad):
        return lax.conv_general_dilated(a.astype(bf16), w.astype(bf16), (1, 1),
                                        pad, dimension_numbers=dn,
                                        preferred_element_type=f32)

    y = jnp.maximum(conv(x, w1f[None, None], "VALID") + b1, 0.0)
    y = jnp.maximum(conv(y, w2f, ((1, 1), (1, 1))) + b2, 0.0)
    y = conv(y, w3f[None, None], "VALID") + b3
    return y + x


# ----------------------------------------------------------------------------
# Main
# ----------------------------------------------------------------------------
if __name__ == "__main__":
    # Module config consistent with residual add (no downsample):
    #   inplanes = 8, planes = 4, expansion = 2  ->  out channels = 8
    N, H, W = 2, 16, 16
    inplanes, planes, expansion = 8, 4, 2
    Cout = planes * expansion

    key = jax.random.PRNGKey(0)
    kx, kp = jax.random.split(key)
    # NHWC end-to-end (the PyTorch module is NCHW; a full-model port keeps
    # activations NHWC so no per-layer transpose is needed).
    x = jax.random.normal(kx, (N, H, W, inplanes), jnp.float32)

    raw = make_params(kp, inplanes, planes, expansion)
    folded = fold_bn(raw)
    packed = pack_for_kernel(folded, N, H, W)

    out = bottleneck_pallas(x, packed)
    jax.block_until_ready(out)

    assert out.shape == (N, H, W, Cout)
    ref_bf16 = bottleneck_reference_bf16(x, folded)   # same mixed precision
    ref_f32 = bottleneck_reference_f32(x, raw)        # full-f32 module semantics
    assert jnp.allclose(out, ref_bf16, atol=2e-3, rtol=2e-3), "mismatch vs bf16 reference"
    assert jnp.allclose(out, ref_f32, atol=5e-2, rtol=5e-2), "mismatch vs f32 reference"

    print("KERNEL_OK")
</pallas_src>

<mosaic_0001>
module attributes {stable_mosaic.version = 11 : i64} {
  func.func @bottleneck_kernel(%arg0: i32, %arg1: memref<32x128xf32, #tpu.memory_space<vmem>>, %arg2: memref<128x64xbf16, #tpu.memory_space<vmem>>, %arg3: memref<1x64xf32, #tpu.memory_space<vmem>>, %arg4: memref<192x64xbf16, #tpu.memory_space<vmem>>, %arg5: memref<1x64xf32, #tpu.memory_space<vmem>>, %arg6: memref<64x128xbf16, #tpu.memory_space<vmem>>, %arg7: memref<1x128xf32, #tpu.memory_space<vmem>>, %arg8: memref<32x32xbf16, #tpu.memory_space<vmem>>, %arg9: memref<32x32xbf16, #tpu.memory_space<vmem>>, %arg10: memref<32x128xf32, #tpu.memory_space<vmem>>) attributes {dimension_semantics = [#tpu.dimension_semantics<arbitrary>], iteration_bounds = array<i64: 1>, scalar_prefetch = 0 : i64, scratch_operands = 0 : i64, tpu.core_type = #tpu.core_type<tc>, window_params = [{pipeline_mode = #tpu.pipeline_mode<synchronous>, transform_indices = @transform_0, window_bounds = array<i64: 32, 128>}, {pipeline_mode = #tpu.pipeline_mode<synchronous>, transform_indices = @transform_1, window_bounds = array<i64: 128, 64>}, {pipeline_mode = #tpu.pipeline_mode<synchronous>, transform_indices = @transform_2, window_bounds = array<i64: 1, 64>}, {pipeline_mode = #tpu.pipeline_mode<synchronous>, transform_indices = @transform_3, window_bounds = array<i64: 192, 64>}, {pipeline_mode = #tpu.pipeline_mode<synchronous>, transform_indices = @transform_4, window_bounds = array<i64: 1, 64>}, {pipeline_mode = #tpu.pipeline_mode<synchronous>, transform_indices = @transform_5, window_bounds = array<i64: 64, 128>}, {pipeline_mode = #tpu.pipeline_mode<synchronous>, transform_indices = @transform_6, window_bounds = array<i64: 1, 128>}, {pipeline_mode = #tpu.pipeline_mode<synchronous>, transform_indices = @transform_7, window_bounds = array<i64: 32, 32>}, {pipeline_mode = #tpu.pipeline_mode<synchronous>, transform_indices = @transform_8, window_bounds = array<i64: 32, 32>}, {pipeline_mode = #tpu.pipeline_mode<synchronous>, transform_indices = @transform_9, window_bounds = array<i64: 32, 128>}]} {
    %c0 = arith.constant 0 : index
    %c0_0 = arith.constant 0 : index
    %0 = vector.load %arg1[%c0, %c0_0] : memref<32x128xf32, #tpu.memory_space<vmem>>, vector<32x128xf32>
    %1 = arith.truncf %0 : vector<32x128xf32> to vector<32x128xbf16>
    %c0_1 = arith.constant 0 : index
    %c0_2 = arith.constant 0 : index
    %2 = vector.load %arg2[%c0_1, %c0_2] : memref<128x64xbf16, #tpu.memory_space<vmem>>, vector<128x64xbf16>
    %cst = arith.constant dense<0.000000e+00> : vector<32x64xf32>
    %3 = tpu.matmul %1, %2, %cst {dimension_numbers = #tpu.dot_dimension_numbers<[1], [0], [0], [1], [0, 0, 1, 1], [], []>} : vector<32x128xbf16>, vector<128x64xbf16>, vector<32x64xf32> -> vector<32x64xf32>
    %c0_3 = arith.constant 0 : index
    %c0_4 = arith.constant 0 : index
    %4 = vector.load %arg3[%c0_3, %c0_4] : memref<1x64xf32, #tpu.memory_space<vmem>>, vector<1x64xf32>
    %5 = vector.broadcast %4 : vector<1x64xf32> to vector<32x64xf32>
    %6 = arith.addf %3, %5 : vector<32x64xf32>
    %cst_5 = arith.constant 0.000000e+00 : f32
    %7 = vector.broadcast %cst_5 : f32 to vector<32x64xf32>
    %8 = arith.maximumf %6, %7 : vector<32x64xf32>
    %9 = arith.truncf %8 : vector<32x64xf32> to vector<32x64xbf16>
    %c0_6 = arith.constant 0 : index
    %c0_7 = arith.constant 0 : index
    %10 = vector.load %arg8[%c0_6, %c0_7] : memref<32x32xbf16, #tpu.memory_space<vmem>>, vector<32x32xbf16>
    %cst_8 = arith.constant dense<0.000000e+00> : vector<32x64xf32>
    %11 = tpu.matmul %10, %9, %cst_8 {dimension_numbers = #tpu.dot_dimension_numbers<[1], [0], [0], [1], [0, 0, 1, 1], [], []>} : vector<32x32xbf16>, vector<32x64xbf16>, vector<32x64xf32> -> vector<32x64xf32>
    %c0_9 = arith.constant 0 : index
    %c0_10 = arith.constant 0 : index
    %12 = vector.load %arg9[%c0_9, %c0_10] : memref<32x32xbf16, #tpu.memory_space<vmem>>, vector<32x32xbf16>
    %cst_11 = arith.constant dense<0.000000e+00> : vector<32x64xf32>
    %13 = tpu.matmul %12, %9, %cst_11 {dimension_numbers = #tpu.dot_dimension_numbers<[1], [0], [0], [1], [0, 0, 1, 1], [], []>} : vector<32x32xbf16>, vector<32x64xbf16>, vector<32x64xf32> -> vector<32x64xf32>
    %14 = tpu.concatenate %11, %8, %13 in 1 : vector<32x64xf32>, vector<32x64xf32>, vector<32x64xf32> -> vector<32x192xf32>
    %15 = arith.truncf %14 : vector<32x192xf32> to vector<32x192xbf16>
    %c0_12 = arith.constant 0 : index
    %c0_13 = arith.constant 0 : index
    %16 = vector.load %arg4[%c0_12, %c0_13] : memref<192x64xbf16, #tpu.memory_space<vmem>>, vector<192x64xbf16>
    %cst_14 = arith.constant dense<0.000000e+00> : vector<32x64xf32>
    %17 = tpu.matmul %15, %16, %cst_14 {dimension_numbers = #tpu.dot_dimension_numbers<[1], [0], [0], [1], [0, 0, 1, 1], [], []>} : vector<32x192xbf16>, vector<192x64xbf16>, vector<32x64xf32> -> vector<32x64xf32>
    %c0_15 = arith.constant 0 : index
    %c0_16 = arith.constant 0 : index
    %18 = vector.load %arg5[%c0_15, %c0_16] : memref<1x64xf32, #tpu.memory_space<vmem>>, vector<1x64xf32>
    %19 = vector.broadcast %18 : vector<1x64xf32> to vector<32x64xf32>
    %20 = arith.addf %17, %19 : vector<32x64xf32>
    %cst_17 = arith.constant 0.000000e+00 : f32
    %21 = vector.broadcast %cst_17 : f32 to vector<32x64xf32>
    %22 = arith.maximumf %20, %21 : vector<32x64xf32>
    %23 = arith.truncf %22 : vector<32x64xf32> to vector<32x64xbf16>
    %c0_18 = arith.constant 0 : index
    %c0_19 = arith.constant 0 : index
    %24 = vector.load %arg6[%c0_18, %c0_19] : memref<64x128xbf16, #tpu.memory_space<vmem>>, vector<64x128xbf16>
    %cst_20 = arith.constant dense<0.000000e+00> : vector<32x128xf32>
    %25 = tpu.matmul %23, %24, %cst_20 {dimension_numbers = #tpu.dot_dimension_numbers<[1], [0], [0], [1], [0, 0, 1, 1], [], []>} : vector<32x64xbf16>, vector<64x128xbf16>, vector<32x128xf32> -> vector<32x128xf32>
    %c0_21 = arith.constant 0 : index
    %c0_22 = arith.constant 0 : index
    %26 = vector.load %arg7[%c0_21, %c0_22] : memref<1x128xf32, #tpu.memory_space<vmem>>, vector<1x128xf32>
    %27 = vector.broadcast %26 : vector<1x128xf32> to vector<32x128xf32>
    %28 = arith.addf %25, %27 : vector<32x128xf32>
    %29 = arith.addf %28, %0 : vector<32x128xf32>
    %c0_23 = arith.constant 0 : index
    %c0_24 = arith.constant 0 : index
    %30 = vector.load %arg10[%c0_23, %c0_24] : memref<32x128xf32, #tpu.memory_space<vmem>>, vector<32x128xf32>
    tpu.vector_store %arg10[%c0_23, %c0_24], %29 {strides = array<i32>} : memref<32x128xf32, #tpu.memory_space<vmem>>, vector<32x128xf32>,
    return
  }
  func.func @transform_0(%arg0: i32) -> (i32, i32) {
    %c0_i32 = arith.constant 0 : i32
    %c0_i32_0 = arith.constant 0 : i32
    %c0_i32_1 = arith.constant 0 : i32
    return %c0_i32, %c0_i32_0 : i32, i32
  }
  func.func @transform_1(%arg0: i32) -> (i32, i32) {
    %c0_i32 = arith.constant 0 : i32
    %c0_i32_0 = arith.constant 0 : i32
    %c0_i32_1 = arith.constant 0 : i32
    return %c0_i32, %c0_i32_0 : i32, i32
  }
  func.func @transform_2(%arg0: i32) -> (i32, i32) {
    %c0_i32 = arith.constant 0 : i32
    %c0_i32_0 = arith.constant 0 : i32
    %c0_i32_1 = arith.constant 0 : i32
    return %c0_i32, %c0_i32_0 : i32, i32
  }
  func.func @transform_3(%arg0: i32) -> (i32, i32) {
    %c0_i32 = arith.constant 0 : i32
    %c0_i32_0 = arith.constant 0 : i32
    %c0_i32_1 = arith.constant 0 : i32
    return %c0_i32, %c0_i32_0 : i32, i32
  }
  func.func @transform_4(%arg0: i32) -> (i32, i32) {
    %c0_i32 = arith.constant 0 : i32
    %c0_i32_0 = arith.constant 0 : i32
    %c0_i32_1 = arith.constant 0 : i32
    return %c0_i32, %c0_i32_0 : i32, i32
  }
  func.func @transform_5(%arg0: i32) -> (i32, i32) {
    %c0_i32 = arith.constant 0 : i32
    %c0_i32_0 = arith.constant 0 : i32
    %c0_i32_1 = arith.constant 0 : i32
    return %c0_i32, %c0_i32_0 : i32, i32
  }
  func.func @transform_6(%arg0: i32) -> (i32, i32) {
    %c0_i32 = arith.constant 0 : i32
    %c0_i32_0 = arith.constant 0 : i32
    %c0_i32_1 = arith.constant 0 : i32
    return %c0_i32, %c0_i32_0 : i32, i32
  }
  func.func @transform_7(%arg0: i32) -> (i32, i32) {
    %c0_i32 = arith.constant 0 : i32
    %c0_i32_0 = arith.constant 0 : i32
    %c0_i32_1 = arith.constant 0 : i32
    return %c0_i32, %c0_i32_0 : i32, i32
  }
  func.func @transform_8(%arg0: i32) -> (i32, i32) {
    %c0_i32 = arith.constant 0 : i32
    %c0_i32_0 = arith.constant 0 : i32
    %c0_i32_1 = arith.constant 0 : i32
    return %c0_i32, %c0_i32_0 : i32, i32
  }
  func.func @transform_9(%arg0: i32) -> (i32, i32) {
    %c0_i32 = arith.constant 0 : i32
    %c0_i32_0 = arith.constant 0 : i32
    %c0_i32_1 = arith.constant 0 : i32
    return %c0_i32, %c0_i32_0 : i32, i32
  }
}

</mosaic_0001>

<bundles_post_ra>
// kernel: tpu_custom_call.1
= control target key start
LH: loop header
LB: loop body
LE: loop exit
PB: predicated region body
PF: predicated region fallthrough
CT: control target
= control target key end

     0   :  { %s979_s0 = inlined_call_operand.vmem [shape: f32[32,128], index: 0, kind: input, shape index: {}]   ;;  %s980_s1 = inlined_call_operand.vmem [shape: bf16[128,64], index: 1, kind: input, shape index: {}]   ;;  %s981_s2 = inlined_call_operand.vmem [shape: f32[1,64], index: 2, kind: input, shape index: {}]   ;;  %s982_s3 = inlined_call_operand.vmem [shape: bf16[192,64], index: 3, kind: input, shape index: {}]   ;;  %s983_s4 = inlined_call_operand.vmem [shape: f32[1,64], index: 4, kind: input, shape index: {}]   ;;  %s984_s5 = inlined_call_operand.vmem [shape: bf16[64,128], index: 5, kind: input, shape index: {}]   ;;  %s985_s6 = inlined_call_operand.vmem [shape: f32[1,128], index: 6, kind: input, shape index: {}]   ;;  %s986_s7 = inlined_call_operand.vmem [shape: bf16[32,32], index: 7, kind: input, shape index: {}]   ;;  %s987_s8 = inlined_call_operand.vmem [shape: bf16[32,32], index: 8, kind: input, shape index: {}]   ;;  %s988_s9 = inlined_call_operand.hbm [shape: f32[32,128], index: 9, kind: output, shape index: {}]  }
   0x1   :  { %v738_v0 = vld [vmem:[%s980_s1 + $0x38] sm:$0xff]   ;;  %v739_v1 = vld [vmem:[%s980_s1 + $0x30] sm:$0xff]   ;;  %v740_v2 = vld [vmem:[%s980_s1 + $0x28] sm:$0xff]  }
   0x2   :  { %675 = vmatprep.subr.bf16.mxu0 %v738_v0  ;;  %v741_v3 = vld [vmem:[%s980_s1 + $0x20] sm:$0xff]   ;;  %v863_v5 = vld [vmem:[%s979_s0 + $0x8] sm:$0xff]  ;;  %v742_v7 = vld [vmem:[%s980_s1 + $0x18] sm:$0xff]  }
   0x3   :  { %676 = vmatpush3.bf16.msra.mxu0 %v738_v0  ;;  %v858_v4 = vld [vmem:[%s979_s0] sm:$0xff]  ;;  %v743_v8 = vld [vmem:[%s980_s1 + $0x10] sm:$0xff]   ;;  %v744_v9 = vld [vmem:[%s980_s1 + $0x8] sm:$0xff]  }
   0x4   :  { %677 = vmatprep.subr.bf16.mxu0 %v739_v1  ;;  %v38_v6 = vpack.c.bf16 %v863_v5, %v858_v4 }
   0x6   :  { %691 = vmatprep.mubr.bf16.mxu0 %v38_v6 }
   0x7   :  { %678 = vmatpush3.bf16.msra.mxu0 %v739_v1 }
   0x8   :  { %679 = vmatprep.subr.bf16.mxu0 %v740_v2 }
   0xb   :  { %680 = vmatpush3.bf16.msra.mxu0 %v740_v2 }
   0xc   :  { %681 = vmatprep.subr.bf16.mxu0 %v741_v3 }
   0xf   :  { %682 = vmatpush3.bf16.msra.mxu0 %v741_v3 }
  0x10   :  { %683 = vmatprep.subr.bf16.mxu0 %v742_v7 }
  0x13   :  { %684 = vmatpush3.bf16.msra.mxu0 %v742_v7 }
  0x14   :  { %685 = vmatprep.subr.bf16.mxu0 %v743_v8 }
  0x15   :  { %14 = vsyncpa [#allocation3], 0  ;;  %v745_v10 = vld [vmem:[%s980_s1] sm:$0xff]   ;;  %v882_v11 = vld [vmem:[%s979_s0 + $0x10] sm:$0xff]  ;;  %vm180_vm0 = vcmask 261120   ;;  %s788_s16 = smov 64  }
  0x16   :  { %v887_v12 = vld [vmem:[%s979_s0 + $0x18] sm:$0xff]  ;;  %v746_v14 = vld [vmem:[%s986_s7] sm:$0xff]   ;;  %v748_v33 = vld [vmem:[%s986_s7 + $0x8] sm:$0xff]   ;;  %v789_v36 = vmov 0   ;;  %vm321_vm1 = vcmask 523264   ;;  %s790_s25 = smov [#allocation2]  }
  0x17   :  { %686 = vmatpush3.bf16.msra.mxu0 %v743_v8  ;;  %v39_v13 = vpack.c.bf16 %v887_v12, %v882_v11  ;;  %v747_v15 = vld [vmem:[%s987_s8] sm:$0xff]   ;;  %v749_v34 = vld [vmem:[%s987_s8 + $0x8] sm:$0xff]   ;;  %v750_v35 = vld [vmem:[%s982_s3 + $0x38] sm:$0xff]   ;;  %s601_s26 = sshll.u32 %s790_s25, 4  ;;  %s602_s26 = int_to_ptr.vmem [resolvable:$true] %s601_s26 }
  0x18   :  { %687 = vmatprep.subr.bf16.mxu0 %v744_v9  ;;  %707 = vmatprep.mubr.msk.bf16.mxu1 %vm180_vm0, %v747_v15  ;;  %v612_v17 = vld [vmem:[%s981_s2] ss:$0 sm:$0xff]  ;;  %v751_v37 = vld [vmem:[%s982_s3 + $0x30] sm:$0xff]   ;;  %v752_v38 = vld [vmem:[%s982_s3 + $0x28] sm:$0xff]   ;;  %p771_p1 = scmp.lt.s32.totalorder %s602_s26, %s602_s26 }
  0x19   :  { %v753_v39 = vld [vmem:[%s982_s3 + $0x20] sm:$0xff]   ;;  %v754_v40 = vld [vmem:[%s982_s3 + $0x18] sm:$0xff]   ;;  %v755_v41 = vld [vmem:[%s982_s3 + $0x10] sm:$0xff]  }
  0x1a   :  { %v756_v42 = vld [vmem:[%s982_s3 + $0x8] sm:$0xff]   ;;  %v757_v43 = vld [vmem:[%s982_s3] sm:$0xff]   ;;  %v758_v44 = vld [vmem:[%s982_s3 + $0x58] sm:$0xff]  }
  0x1b   :  { %688 = vmatpush3.bf16.msra.mxu0 %v744_v9  ;;  %v759_v45 = vld [vmem:[%s982_s3 + $0x50] sm:$0xff]   ;;  %v760_v46 = vld [vmem:[%s982_s3 + $0x48] sm:$0xff]   ;;  %v761_v47 = vld [vmem:[%s982_s3 + $0x40] sm:$0xff]  }
  0x1c   :  { %689 = vmatprep.subr.bf16.mxu0 %v745_v10  ;;  %v762_v8 = vld [vmem:[%s984_s5 + $0x18] sm:$0xff]   ;;  %v763_v9 = vld [vmem:[%s984_s5 + $0x10] sm:$0xff]  }
  0x1f   :  { %690 = vmatpush3.bf16.msra.mxu0 %v745_v10  ;;  %v764_v10 = vld [vmem:[%s984_s5 + $0x8] sm:$0xff]  }
  0x22   :  { %692 = vmatmul.mubr.bf16.vlgmr.msra.gmra.mxu0 %v39_v13  ;;  %v765_v13 = vld [vmem:[%s984_s5] sm:$0xff]  }
  0x23   :  { %699 = vmatprep.mubr.msk.bf16.mxu0 %vm180_vm0, %v746_v14  ;;  %v629_v14 = vld [vmem:[%s983_s4] ss:$0 sm:$0xff] }
  0xe2   :  { %v693_v16 = vpop.f32.mrf.mxu0 }
  0xe3   :  { %v154_v19 = vadd.f32 %v693_v16, %v612_v17 }
  0xe4   :  { %v145_v18 = vpop.f32.mrf.mxu0 }
  0xe5   :  { %v146_v21 = vadd.f32 %v612_v17, %v145_v18  ;;  %v162_v24 = vmax.f32 %v154_v19, 0.0 }
  0xe6   :  { %v694_v20 = vpop.f32.mrf.mxu0 }
  0xe7   :  { %v157_v22 = vadd.f32 %v694_v20, %v612_v17  ;;  %v160_v27 = vmax.f32 %v146_v21, 0.0 }
  0xe8   :  { %v148_v23 = vpop.f32.mrf.mxu0 }
  0xe9   :  { %v163_v25 = vmax.f32 %v157_v22, 0.0  ;;  %v149_v26 = vadd.f32 %v612_v17, %v148_v23 }
  0xeb   :  { %v165_v28 = vpack.c.bf16 %v163_v25, %v162_v24  ;;  %v161_v29 = vmax.f32 %v149_v26, 0.0  ;;  %v733_v32 = vpack.i.bf16 %v163_v25, %v162_v24 }
  0xed   :  { %v164_v30 = vpack.c.bf16 %v161_v29, %v160_v27  ;;  %695 = vmatprep.subr.bf16.mxu0 %v165_v28  ;;  %703 = vmatprep.subr.bf16.mxu1 %v165_v28  ;;  %v728_v31 = vpack.i.bf16 %v161_v29, %v160_v27 }
  0xee   :  { %696 = vmatpush3.bf16.msra.mxu0 %v165_v28  ;;  %704 = vmatpush3.bf16.msra.mxu1 %v165_v28 }
  0xef   :  { %729 = vrot.lane.b32.xlu0 %v728_v31, %s788_s16  ;;  %697 = vmatprep.subr.bf16.mxu0 %v164_v30 }
  0xf0   :  { %705 = vmatprep.subr.bf16.mxu1 %v164_v30 }
  0xf2   :  { %698 = vmatpush3.bf16.msra.mxu0 %v164_v30  ;;  %706 = vmatpush3.bf16.msra.mxu1 %v164_v30 }
  0xf3   :  { %734 = vrot.lane.b32.xlu0 %v733_v32, %s788_s16  ;;  %439 = vmatprep.subr.bf16.mxu1 %v789_v36 }
  0xf4   :  { %711 = vmatprep.subr.bf16.mxu0 %v762_v8 }
  0xf5   :  { %700 = vmatmul.mubr.msk.bf16.vlgmr.msra.gmra.mxu0 %vm180_vm0, %v748_v33  ;;  %708 = vmatmul.mubr.msk.bf16.vlgmr.msra.gmra.mxu1 %vm180_vm0, %v749_v34  ;;  %v644_v33 = vld [vmem:[%s985_s6] ss:$0 sm:$0xff]  ;;  %s766_s6 = scalar_lea.vmem %s602_s26, 512 }
  0xf6   :  { %440 = vmatpush1.bf16.msra.mxu1 %v750_v35  ;;  %712 = vmatpush3.bf16.msra.mxu0 %v762_v8  ;;  %p767_p0 = scmp.ne.s32.totalorder %s602_s26, %s766_s6  ;;  %p772_p2 = scmp.lt.s32.totalorder %s766_s6, %s766_s6 }
  0xf7   :  { %441 = vmatprep.subr.bf16.mxu1 %v789_v36  ;;  %713 = vmatprep.subr.bf16.mxu0 %v763_v9 }
  0xf8   :  { %p773_p3 = por %p772_p2, %p771_p1 }
  0xfa   :  { %442 = vmatpush1.bf16.msra.mxu1 %v751_v37  ;;  %714 = vmatpush3.bf16.msra.mxu0 %v763_v9  ;;  %p774_p4 = pnand %p773_p3, %p767_p0 }
  0xfb   :  { %443 = vmatprep.subr.bf16.mxu1 %v789_v36  ;;  %715 = vmatprep.subr.bf16.mxu0 %v764_v10 }
  0xfe   :  { %444 = vmatpush1.bf16.msra.mxu1 %v752_v38  ;;  %716 = vmatpush3.bf16.msra.mxu0 %v764_v10 }
  0xff   :  { %445 = vmatprep.subr.bf16.mxu1 %v789_v36  ;;  %717 = vmatprep.subr.bf16.mxu0 %v765_v13 }
 0x102   :  { %446 = vmatpush1.bf16.msra.mxu1 %v753_v39  ;;  %718 = vmatpush3.bf16.msra.mxu0 %v765_v13 }
 0x103   :  { %447 = vmatprep.subr.bf16.mxu1 %v789_v36 }
 0x106   :  { %448 = vmatpush1.bf16.msra.mxu1 %v754_v40 }
 0x107   :  { %449 = vmatprep.subr.bf16.mxu1 %v789_v36 }
 0x10a   :  { %450 = vmatpush1.bf16.msra.mxu1 %v755_v41 }
 0x10b   :  { %451 = vmatprep.subr.bf16.mxu1 %v789_v36 }
 0x10e   :  { %452 = vmatpush1.bf16.msra.mxu1 %v756_v42 }
 0x10f   :  { %453 = vmatprep.subr.bf16.mxu1 %v789_v36 }
 0x112   :  { %454 = vmatpush1.bf16.msra.mxu1 %v757_v43 }
 0x113   :  { %463 = vmatprep.subr.bf16.mxu1 %v789_v36 }
 0x116   :  { %464 = vmatpush2.bf16.msra.mxu1 %v758_v44 }
 0x117   :  { %465 = vmatprep.subr.bf16.mxu1 %v789_v36 }
 0x11a   :  { %466 = vmatpush2.bf16.msra.mxu1 %v759_v45 }
 0x11b   :  { %467 = vmatprep.subr.bf16.mxu1 %v789_v36 }
 0x11e   :  { %468 = vmatpush2.bf16.msra.mxu1 %v760_v46 }
 0x11f   :  { %469 = vmatprep.subr.bf16.mxu1 %v789_v36 }
 0x122   :  { %470 = vmatpush2.bf16.msra.mxu1 %v761_v47 }
 0x161   :  { %v730_v50 = vpop.permute.xlu0 %729 }
 0x162   :  { %v732_v55 = vunpack.i.h.bf16 %v730_v50  ;;  %v731_v56 = vunpack.i.l.bf16 %v730_v50 }
 0x165   :  { %v735_v62 = vpop.permute.xlu0 %734 }
 0x166   :  { %v737_v1 = vunpack.i.h.bf16 %v735_v62  ;;  %v736_v2 = vunpack.i.l.bf16 %v735_v62 }
 0x1b5   :  { %v701_v48 = vpop.f32.mrf.mxu0  ;;  %v709_v49 = vpop.f32.mrf.mxu1 }
 0x1b6   :  { %v324_v6 = vsel %vm321_vm1, %v701_v48, %v736_v2 }
 0x1b7   :  { %v221_v51 = vpop.f32.mrf.mxu0  ;;  %v290_v52 = vpop.f32.mrf.mxu1 }
 0x1b8   :  { %v322_v59 = vsel %vm321_vm1, %v221_v51, %v731_v56 }
 0x1b9   :  { %v702_v53 = vpop.f32.mrf.mxu0  ;;  %v710_v54 = vpop.f32.mrf.mxu1 }
 0x1ba   :  { %v329_v0 = vpack.c.bf16 %v710_v54, %v709_v49  ;;  %v325_v3 = vsel %vm321_vm1, %v702_v53, %v737_v1 }
 0x1bb   :  { %v224_v57 = vpop.f32.mrf.mxu0  ;;  %v293_v58 = vpop.f32.mrf.mxu1  ;;  %v328_v7 = vpack.c.bf16 %v325_v3, %v324_v6 }
 0x1bc   :  { %v323_v60 = vsel %vm321_vm1, %v224_v57, %v732_v55  ;;  %v327_v61 = vpack.c.bf16 %v293_v58, %v290_v52 }
 0x1bd   :  { %v326_v63 = vpack.c.bf16 %v323_v60, %v322_v59 }
 0x1be   :  { %642 = vmatprep.mubr.msk.bf16.mxu1 %vm321_vm1, %v327_v61 }
 0x1bf   :  { %472 = vmatmul.mubr.bf16.vlgmr.msra.gmra.mxu1 %v326_v63 }
 0x1c0   :  { %643 = vmatprep.mubr.msk.bf16.mxu1 %vm321_vm1, %v329_v0 }
 0x1c7   :  { %480 = vmatmul.mubr.bf16.gmra.mxu1 %v328_v7 }
 0x27f   :  { %v473_v15 = vpop.f32.mrf.mxu1 }
 0x280   :  { %v474_v17 = vadd.f32 %v629_v14, %v473_v15 }
 0x281   :  { %v475_v16 = vpop.f32.mrf.mxu1 }
 0x282   :  { %v488_v21 = vmax.f32 %v474_v17, 0.0 }
 0x283   :  { %v476_v18 = vpop.f32.mrf.mxu1 }
 0x284   :  { %v477_v19 = vadd.f32 %v629_v14, %v476_v18 }
 0x285   :  { %v478_v20 = vpop.f32.mrf.mxu1 }
 0x286   :  { %v489_v22 = vmax.f32 %v477_v19, 0.0 }
 0x287   :  { %v481_v23 = vpop.f32.mrf.mxu1 }
 0x288   :  { %v492_v24 = vpack.c.bf16 %v489_v22, %v488_v21  ;;  %v482_v26 = vadd.f32 %v629_v14, %v481_v23 }
 0x289   :  { %v483_v25 = vpop.f32.mrf.mxu1 }
 0x28a   :  { %719 = vmatprep.mubr.msk.bf16.mxu0 %vm321_vm1, %v492_v24  ;;  %v490_v30 = vmax.f32 %v482_v26, 0.0 }
 0x28b   :  { %v484_v27 = vpop.f32.mrf.mxu1 }
 0x28c   :  { %v485_v28 = vadd.f32 %v629_v14, %v484_v27 }
 0x28d   :  { %v486_v29 = vpop.f32.mrf.mxu1 }
 0x28e   :  { %v491_v31 = vmax.f32 %v485_v28, 0.0 }
 0x290   :  { %v493_v32 = vpack.c.bf16 %v491_v31, %v490_v30 }
 0x292   :  { %720 = vmatmul.mubr.msk.bf16.vlgmr.msra.gmra.mxu0 %vm321_vm1, %v493_v32 }
 0x352   :  { %v721_v34 = vpop.f32.mrf.mxu0 }
 0x353   :  { %v582_v35 = vadd.f32 %v721_v34, %v644_v33 }
 0x354   :  { %v573_v36 = vpop.f32.mrf.mxu0 }
 0x355   :  { %v590_v37 = vadd.f32 %v582_v35, %v882_v11  ;;  %v574_v38 = vadd.f32 %v644_v33, %v573_v36 }
 0x356   :  { %v722_v39 = vpop.f32.mrf.mxu0 }
 0x357   :  { %594 = vst [vmem:[#allocation2 + $0x10] sm:$0xff] %v590_v37  ;;  %v588_v40 = vadd.f32 %v574_v38, %v858_v4  ;;  %v585_v41 = vadd.f32 %v722_v39, %v644_v33 }
 0x358   :  { %v576_v42 = vpop.f32.mrf.mxu0 }
 0x359   :  { %592 = vst [vmem:[#allocation2] sm:$0xff] %v588_v40  ;;  %v591_v43 = vadd.f32 %v585_v41, %v887_v12  ;;  %v577_v44 = vadd.f32 %v644_v33, %v576_v42 }
 0x35b   :  { %595 = vst [vmem:[#allocation2 + $0x18] sm:$0xff] %v591_v43  ;;  %v589_v45 = vadd.f32 %v577_v44, %v863_v5 }
 0x35d   :  { %593 = vst [vmem:[#allocation2 + $0x8] sm:$0xff] %v589_v45 }
 0x35e   :  { %777 = shalt.err (!%p774_p4)
}
 0x35f   :  { %s791_s27 = smov 128   ;;  %s792_s28 = smov 8  }
 0x360   :  { %607 = dma.vmem_to_hbm [thread:$0]  %s602_s26, 512, %s988_s9, [#allocation3], %s791_s27, %s791_s27, %s792_s28  }
 0x361   :  { %786 = dma.done.wait [#allocation3], 512  }
 0x362   :  { %787 = vsyncadd [#allocation3], 4294966784 }
 0x363   :  { %611 = vsyncpa [#allocation3], 1 }

</bundles_post_ra>
